<compile_context>
chip_gen: v5e
topology: v5e:2x2
jax: 0.10.0
libtpu: 0.0.40
codegen_flags: <defaults>
</compile_context>

<pallas_src>
import jax
import jax.numpy as jnp
from jax.experimental import pallas as pl
from jax.experimental.pallas import tpu as pltpu

EPS = 1e-5  # PyTorch BatchNorm2d default


def _softplus(v):
    # Numerically stable softplus: max(v,0) + log1p(exp(-|v|))
    # (matches PyTorch softplus(beta=1) to well below f32 precision).
    return jnp.maximum(v, 0.0) + jnp.log1p(jnp.exp(-jnp.abs(v)))


# --------------------------------------------------------------------------------------
# Pass 1: per-channel batch statistics (sum and sum of squares), accumulated across tiles
# --------------------------------------------------------------------------------------
def stats_kernel(x_ref, sum_ref, sumsq_ref):
    @pl.when(pl.program_id(0) == 0)
    def _():
        sum_ref[...] = jnp.zeros_like(sum_ref)
        sumsq_ref[...] = jnp.zeros_like(sumsq_ref)

    x = x_ref[...]                                   # (C, TN) lane-dense
    sum_ref[...] += jnp.sum(x, axis=1, keepdims=True)
    sumsq_ref[...] += jnp.sum(x * x, axis=1, keepdims=True)


# --------------------------------------------------------------------------------------
# Pass 2: fused conv1/conv2 + softplus + folded (bn1+bn2) affine + adds
# --------------------------------------------------------------------------------------
def main_kernel(x_ref, w_ref, b_ref, scale_ref, shift_ref, o_ref):
    x = x_ref[...]                                   # (C_in, TN) float32, lane-dense
    w = w_ref[...]                                   # (2*C_out, C_in) fused conv weights
    c_in = x.shape[0]
    c_out = o_ref.shape[0]

    # Both 1x1 convs at once as VPU FMAs over lane-dense vregs:
    #   z[co, n] = b[co] + sum_ci w[co, ci] * x[ci, n]
    z = b_ref[...] + w[:, 0:1] * x[0:1, :]           # (2*C_out, TN)
    for ci in range(1, c_in):                        # static unroll, c_in == 8
        z = z + w[:, ci:ci + 1] * x[ci:ci + 1, :]

    # softplus on the fused block (both convs back-to-back through the EUP), then sum.
    sp = _softplus(z)
    v5 = sp[:c_out, :] + sp[c_out:, :]               # (C_out, TN)

    # bn1(x) + bn2(x) folded into one per-channel affine (scale/shift precomputed
    # from full-batch statistics): v8 = x*scale + shift.
    o_ref[...] = v5 + x * scale_ref[...] + shift_ref[...]


def _pick_tile(n, cap=1024):
    """Largest multiple-of-128 divisor of n that is <= cap; fall back to n (full block)."""
    best = None
    cand = 128
    while cand <= min(n, cap):
        if n % cand == 0:
            best = cand
        cand += 128
    return best if best is not None else n


def model_forward(x_nchw, params, tn=None):
    """x_nchw: (B, C, H, W) float32. Returns (B, C_out, H, W) float32."""
    w1, b1, w2, b2, g1, be1, g2, be2 = params
    B, C, H, W = x_nchw.shape
    C_out = w1.shape[0]
    N = B * H * W

    # NCHW -> (C, N): only the tiny B/C axes move; the H*W fast axis stays contiguous.
    x_cn = jnp.transpose(x_nchw.reshape(B, C, H * W), (1, 0, 2)).reshape(C, N)
    x_cn = x_cn.astype(jnp.float32)

    if tn is None:
        tn = _pick_tile(N)
    assert N % tn == 0, f"tile {tn} must divide N={N}"
    grid = (N // tn,)

    # ---- pass 1: batch statistics over ALL pixels (accumulated across the grid) ----
    s, sq = pl.pallas_call(
        stats_kernel,
        out_shape=(jax.ShapeDtypeStruct((C, 1), jnp.float32),
                   jax.ShapeDtypeStruct((C, 1), jnp.float32)),
        grid=grid,
        in_specs=[pl.BlockSpec((C, tn), lambda i: (0, i))],
        out_specs=(pl.BlockSpec((C, 1), lambda i: (0, 0)),
                   pl.BlockSpec((C, 1), lambda i: (0, 0))),
        compiler_params=pltpu.CompilerParams(dimension_semantics=("arbitrary",)),
    )(x_cn)

    # Tiny (C,1) math: fold both BatchNorms into one affine x*scale + shift.
    inv_n = 1.0 / float(N)
    mean = s * inv_n
    var = jnp.maximum(sq * inv_n - mean * mean, 0.0)   # biased (training-mode) variance
    inv = jax.lax.rsqrt(var + EPS)
    g_sum = (g1 + g2).reshape(C, 1).astype(jnp.float32)
    b_sum = (be1 + be2).reshape(C, 1).astype(jnp.float32)
    scale = g_sum * inv
    shift = b_sum - mean * scale

    # Fuse the two conv weights/biases into one block.
    w_fused = jnp.concatenate([w1, w2], axis=0).astype(jnp.float32)          # (2*C_out, C_in)
    b_fused = jnp.concatenate([b1, b2], axis=0).reshape(2 * C_out, 1).astype(jnp.float32)

    # ---- pass 2: main fused kernel, row-parallel over pixel tiles ----
    out_cn = pl.pallas_call(
        main_kernel,
        out_shape=jax.ShapeDtypeStruct((C_out, N), jnp.float32),
        grid=grid,
        in_specs=[
            pl.BlockSpec((C, tn), lambda i: (0, i)),           # x tile
            pl.BlockSpec((2 * C_out, C), lambda i: (0, 0)),    # fused conv weights
            pl.BlockSpec((2 * C_out, 1), lambda i: (0, 0)),    # fused conv biases
            pl.BlockSpec((C, 1), lambda i: (0, 0)),            # folded BN scale
            pl.BlockSpec((C, 1), lambda i: (0, 0)),            # folded BN shift
        ],
        out_specs=pl.BlockSpec((C_out, tn), lambda i: (0, i)),
        compiler_params=pltpu.CompilerParams(dimension_semantics=("parallel",)),
    )(x_cn, w_fused, b_fused, scale, shift)

    # (C_out, N) -> NCHW
    return jnp.transpose(out_cn.reshape(C_out, B, H * W), (1, 0, 2)).reshape(B, C_out, H, W)


def init_params(key, c_in, c_out):
    k1, k2, k3, k4 = jax.random.split(key, 4)
    # Conv2d weights as (C_out, C_in) == PyTorch (C_out, C_in, 1, 1) squeezed.
    w1 = 0.1 * jax.random.normal(k1, (c_out, c_in), dtype=jnp.float32)
    b1 = 0.1 * jax.random.normal(k2, (c_out,), dtype=jnp.float32)
    w2 = 0.1 * jax.random.normal(k3, (c_out, c_in), dtype=jnp.float32)
    b2 = 0.1 * jax.random.normal(k4, (c_out,), dtype=jnp.float32)
    # BatchNorm defaults: gamma = 1, beta = 0
    g1 = jnp.ones((c_in,), jnp.float32)
    be1 = jnp.zeros((c_in,), jnp.float32)
    g2 = jnp.ones((c_in,), jnp.float32)
    be2 = jnp.zeros((c_in,), jnp.float32)
    return (w1, b1, w2, b2, g1, be1, g2, be2)


def _reference(x_nchw, params):
    """Pure-JAX reference of the same forward (for correctness check)."""
    w1, b1, w2, b2, g1, be1, g2, be2 = params
    x = x_nchw.astype(jnp.float32)
    v1 = jnp.einsum("oc,bchw->bohw", w1, x) + b1[None, :, None, None]
    v2 = jnp.einsum("oc,bchw->bohw", w2, x) + b2[None, :, None, None]
    v5 = _softplus(v1) + _softplus(v2)
    mean = x.mean(axis=(0, 2, 3), keepdims=True)
    var = (x * x).mean(axis=(0, 2, 3), keepdims=True) - mean * mean
    xhat = (x - mean) * jax.lax.rsqrt(var + EPS)
    v6 = xhat * g1[None, :, None, None] + be1[None, :, None, None]
    v7 = xhat * g2[None, :, None, None] + be2[None, :, None, None]
    return v5 + v6 + v7


if __name__ == "__main__":
    key = jax.random.PRNGKey(0)
    kx, kp = jax.random.split(key)

    B, C, H, W = 2, 8, 16, 16              # small, self-consistent shapes (N = 512 pixels)
    x = jax.random.normal(kx, (B, C, H, W), dtype=jnp.float32)
    params = init_params(kp, c_in=C, c_out=C)

    # tn=128 -> 4-step grid to exercise the tiled/accumulator path at this small size
    # (at realistic sizes the default auto-picked tile of up to 1024 lanes is used).
    out = jax.block_until_ready(model_forward(x, params, tn=128))
    assert out.shape == (B, C, H, W)
    assert bool(jnp.all(jnp.isfinite(out)))

    ref = _reference(x, params)
    max_err = float(jnp.max(jnp.abs(out - ref)))
    assert jnp.allclose(out, ref, atol=1e-4, rtol=1e-4), f"max abs err {max_err}"
    print("KERNEL_OK")
</pallas_src>

<mosaic_0001>
module attributes {stable_mosaic.version = 11 : i64} {
  func.func @stats_kernel(%arg0: i32, %arg1: memref<8x128xf32, #tpu.memory_space<vmem>>, %arg2: memref<8x1xf32, #tpu.memory_space<vmem>>, %arg3: memref<8x1xf32, #tpu.memory_space<vmem>>) attributes {dimension_semantics = [#tpu.dimension_semantics<arbitrary>], iteration_bounds = array<i64: 4>, scalar_prefetch = 0 : i64, scratch_operands = 0 : i64, tpu.core_type = #tpu.core_type<tc>, window_params = [{transform_indices = @transform_0, window_bounds = array<i64: 8, 128>}, {pipeline_mode = #tpu.pipeline_mode<synchronous>, transform_indices = @transform_1, window_bounds = array<i64: 8, 1>}, {pipeline_mode = #tpu.pipeline_mode<synchronous>, transform_indices = @transform_2, window_bounds = array<i64: 8, 1>}]} {
    %c0_i32 = arith.constant 0 : i32
    %0 = arith.cmpi eq, %arg0, %c0_i32 : i32
    %1 = arith.extui %0 : i1 to i32
    %c0_i32_0 = arith.constant 0 : i32
    %2 = arith.cmpi ne, %1, %c0_i32_0 : i32
    scf.if %2 {
      %cst_11 = arith.constant 0.000000e+00 : f32
      %15 = vector.broadcast %cst_11 : f32 to vector<8x1xf32>
      %c0_12 = arith.constant 0 : index
      %c0_13 = arith.constant 0 : index
      %16 = vector.load %arg2[%c0_12, %c0_13] : memref<8x1xf32, #tpu.memory_space<vmem>>, vector<8x1xf32>
      tpu.vector_store %arg2[%c0_12, %c0_13], %15 {strides = array<i32>} : memref<8x1xf32, #tpu.memory_space<vmem>>, vector<8x1xf32>,
      %cst_14 = arith.constant 0.000000e+00 : f32
      %17 = vector.broadcast %cst_14 : f32 to vector<8x1xf32>
      %c0_15 = arith.constant 0 : index
      %c0_16 = arith.constant 0 : index
      %18 = vector.load %arg3[%c0_15, %c0_16] : memref<8x1xf32, #tpu.memory_space<vmem>>, vector<8x1xf32>
      tpu.vector_store %arg3[%c0_15, %c0_16], %17 {strides = array<i32>} : memref<8x1xf32, #tpu.memory_space<vmem>>, vector<8x1xf32>,
    } else {
    }
    %c0 = arith.constant 0 : index
    %c0_1 = arith.constant 0 : index
    %3 = vector.load %arg1[%c0, %c0_1] : memref<8x128xf32, #tpu.memory_space<vmem>>, vector<8x128xf32>
    %c0_2 = arith.constant 0 : index
    %c0_3 = arith.constant 0 : index
    %4 = vector.load %arg2[%c0_2, %c0_3] : memref<8x1xf32, #tpu.memory_space<vmem>>, vector<8x1xf32>
    %cst = arith.constant dense<0.000000e+00> : vector<8xf32>
    %5 = vector.multi_reduction <add>, %3, %cst [1] : vector<8x128xf32> to vector<8xf32>
    %6 = vector.shape_cast %5 : vector<8xf32> to vector<8x1xf32>
    %7 = arith.addf %4, %6 : vector<8x1xf32>
    %c0_4 = arith.constant 0 : index
    %c0_5 = arith.constant 0 : index
    %8 = vector.load %arg2[%c0_4, %c0_5] : memref<8x1xf32, #tpu.memory_space<vmem>>, vector<8x1xf32>
    tpu.vector_store %arg2[%c0_4, %c0_5], %7 {strides = array<i32>} : memref<8x1xf32, #tpu.memory_space<vmem>>, vector<8x1xf32>,
    %c0_6 = arith.constant 0 : index
    %c0_7 = arith.constant 0 : index
    %9 = vector.load %arg3[%c0_6, %c0_7] : memref<8x1xf32, #tpu.memory_space<vmem>>, vector<8x1xf32>
    %10 = arith.mulf %3, %3 : vector<8x128xf32>
    %cst_8 = arith.constant dense<0.000000e+00> : vector<8xf32>
    %11 = vector.multi_reduction <add>, %10, %cst_8 [1] : vector<8x128xf32> to vector<8xf32>
    %12 = vector.shape_cast %11 : vector<8xf32> to vector<8x1xf32>
    %13 = arith.addf %9, %12 : vector<8x1xf32>
    %c0_9 = arith.constant 0 : index
    %c0_10 = arith.constant 0 : index
    %14 = vector.load %arg3[%c0_9, %c0_10] : memref<8x1xf32, #tpu.memory_space<vmem>>, vector<8x1xf32>
    tpu.vector_store %arg3[%c0_9, %c0_10], %13 {strides = array<i32>} : memref<8x1xf32, #tpu.memory_space<vmem>>, vector<8x1xf32>,
    return
  }
  func.func @transform_0(%arg0: i32) -> (i32, i32) {
    %c0_i32 = arith.constant 0 : i32
    %c0_i32_0 = arith.constant 0 : i32
    return %c0_i32, %arg0 : i32, i32
  }
  func.func @transform_1(%arg0: i32) -> (i32, i32) {
    %c0_i32 = arith.constant 0 : i32
    %c0_i32_0 = arith.constant 0 : i32
    %c0_i32_1 = arith.constant 0 : i32
    return %c0_i32, %c0_i32_0 : i32, i32
  }
  func.func @transform_2(%arg0: i32) -> (i32, i32) {
    %c0_i32 = arith.constant 0 : i32
    %c0_i32_0 = arith.constant 0 : i32
    %c0_i32_1 = arith.constant 0 : i32
    return %c0_i32, %c0_i32_0 : i32, i32
  }
}

</mosaic_0001>

<bundles_post_ra>
// kernel: tpu_custom_call.1
= control target key start
LH: loop header
LB: loop body
LE: loop exit
PB: predicated region body
PF: predicated region fallthrough
CT: control target
= control target key end

     0   :  { %8 = vsyncpa [#allocation3], 0  ;;  %s451_s0 = inlined_call_operand.hbm [shape: f32[8,512], index: 0, kind: input, shape index: {}]   ;;  %s452_s1 = inlined_call_operand.vmem [shape: f32[8,1], index: 1, kind: output, shape index: {0}]   ;;  %s453_s2 = inlined_call_operand.vmem [shape: f32[8,1], index: 2, kind: output, shape index: {1}]  }
   0x1   :  { %10 = vsyncpa [#allocation3 + $0x1], 0  ;;  %s343_s9 = smov 0   ;;  %s345_s10 = smov 0  }
   0x2   :  { %s347_s11 = smov 0   ;;  %s349_s12 = smov 0  }
   0x3 LB: > { %s211_s13 = sadd.s32 4294967295, %s325_s12   ;;  %s363_s14 = sadd.s32 1, %s325_s12   ;;  %s325_s12 = sphi %s349_s12, %s460_s12   ;;  %s321_s11 = sphi %s347_s11, %s459_s11   ;;  %s317_s10 = sphi %s345_s10, %s458_s10   ;;  %s313_s9 = sphi %s343_s9, %s457_s9  }
   0x4   : > { %s20_s15 = ssub.s32 %s325_s12, %s363_s14  ;;  %s23_s16 = sadd.s32 1, %s321_s11 }
   0x5   : > { %p21_p0 = scmp.eq.s32.totalorder %s20_s15, 0  ;;  %p30_p1 = scmp.ne.s32.totalorder %s321_s11, %s317_s10 }
   0x6   : > { %p31_p2 = scmp.eq.s32.totalorder %s325_s12, 0  ;;  %p36_p3 = scmp.ne.s32.totalorder %s317_s10, %s313_s9 }
   0x7   : > { %s373_s17 = scalar_select %p21_p0, %s321_s11, %s23_s16  }
   0x8   : > { %p375_p4 = por %p31_p2, %p30_p1  ;;  %p37_p5 = scmp.eq.s32.totalorder %s211_s13, 0 }
   0x9   : > { %p227_p6 = scmp.lt.s32.totalorder %s325_s12, 4  ;;  %s102_s20 = sand.u32 1, %s321_s11  }
   0xa   : > { %p382_p7 = por %p37_p5, %p36_p3  ;;  %s214_s21 = sshll.u32 %s102_s20, 3 }
   0xb   : > { %s215_s22 = sshll.u32 %s325_s12, 3  ;;  %s106_s26 = scalar_lea.vmem [#allocation2], %s214_s21 }
   0xc   : > { %s110_s25 = scalar_lea.hbm %s451_s0, %s215_s22  ;;  %s114_s27 = sshll.u32 %s106_s26, 4  ;;  %s115_s27 = int_to_ptr.vmem [resolvable:$true] %s114_s27 }
   0xd   : > { %s112_s28 = sshll.u32 %s110_s25, 4  ;;  %p393_p8 = pnand %p227_p6, %p375_p4  ;;  %s113_s28 = int_to_ptr.hbm [resolvable:$true] %s112_s28 }
   0xe   : > { %p216_p9 = scmp.ge.s32.totalorder %s325_s12, 1  ;;  %p119_p10 = scmp.lt.s32.totalorder %s325_s12, 5 }
   0xf   : > { %s103_s30 = scalar_lea.sflag [#allocation3], %s102_s20  ;;  %s261_s3 = sshra.s32 %s113_s28, 4  ;;  %s262_s3 = int_to_ptr.hbm [resolvable:$true] %s261_s3 }
  0x10   : > { %s263_s4 = scalar_lea.hbm %s262_s3, 8  ;;  %p265_p12 = pneg %p393_p8 }
  0x11   : > { %p264_p11 = scmp.ne.s32.totalorder %s262_s3, %s263_s4  ;;  %s268_s7 = scalar_lea.hbm %s451_s0, 32 }
  0x12   : > { %p269_p1 = scmp.lt.s32.totalorder %s262_s3, %s451_s0  ;;  %p270_p2 = scmp.lt.s32.totalorder %s268_s7, %s263_s4 }
  0x13   : > { %p266_p13 = pnand %p265_p12, %p264_p11 }
  0x14   : > { %p271_p3 = por %p270_p2, %p269_p1 }
  0x15   : > { %p267_p0 = pneg %p266_p13 }
  0x17   : > { %p272_p4 = pnand %p271_p3, %p267_p0 }
  0x19   : > { %275 = shalt.err (!%p272_p4)
}
  0x1a   : > { %226 = dma.hbm_to_vmem [thread:$0]  (!%p393_p8), %s113_s28, 128, %s115_s27, %s103_s30  }
  0x1b   : > { %p120_p5 = pnand %p216_p9, %p119_p10 }
  0x1c   : > { %s125_s15 = sand.u32 (!%p120_p5), 1, %s317_s10  }
  0x1d   : > { %123 = sbr.rel (%p120_p5) target bundleno = 173 (0xad), region = 24  ;;  %s217_s16 = sshll.u32 (!%p120_p5), %s125_s15, 3 }
  0x1e   : > { %s126_s18 = scalar_lea.sflag (!%p120_p5), [#allocation3], %s125_s15  ;;  %s129_s20 = scalar_lea.vmem (!%p120_p5), [#allocation2], %s217_s16 }
  0x22   : > { %308 = dma.done.wait (%p382_p7), %s126_s18, 128  }
  0x23   : > { %310 = vsyncadd (%p382_p7), %s126_s18, 4294967168  ;;  %p218_p6 = scmp.ne.s32.totalorder %s211_s13, 0 }
  0x25   : > { %149 = sbr.rel (%p218_p6) target bundleno = 45 (0x2d), region = 32 }
  0x2a   : > { %vm150_vm0 = vcmask 7168   ;;  %v327_v0 = vmov 0.0  }
  0x2b   : > { %151 = vst.msk [vmem:[%s452_s1] sm:$0xff] %vm150_vm0, %v327_v0 }
  0x2c   : > { %152 = vst.msk [vmem:[%s453_s2] sm:$0xff] %vm150_vm0, %v327_v0 }
  0x2d PF: > { %v153_v1 = vld [vmem:[%s129_s20] sm:$0xff]  ;;  %vm158_vm1 = vcmask 7168  }
  0x2e   : > { %155 = vadd.xlane.f32.xlu0 %v153_v1  ;;  %v161_v2 = vmul.f32 %v153_v1, %v153_v1 }
  0x32   : > { %v154_v3 = vld [vmem:[%s452_s1] sm:$0xff] }
  0x33   : > { %v160_v6 = vld [vmem:[%s453_s2] sm:$0xff] }
  0x36   : > { %162 = vadd.xlane.f32.xlu0 %v161_v2 }
  0xa1   : > { %v156_v4 = vpop.xlane.xlu0 %155 }
  0xa2   : > { %v157_v5 = vadd.f32 %v156_v4, %v154_v3 }
  0xa4   : > { %159 = vst.msk [vmem:[%s452_s1] sm:$0xff] %vm158_vm1, %v157_v5 }
  0xa9   : > { %v163_v7 = vpop.xlane.xlu0 %162 }
  0xaa   : > { %v164_v8 = vadd.f32 %v163_v7, %v160_v6 }
  0xac   : > { %165 = vst.msk [vmem:[%s453_s2] sm:$0xff] %vm158_vm1, %v164_v8 }
  0xad PF: > { %p13_p7 = scmp.ge.s32.totalorder %s363_s14, 6   ;;  %s457_s9 = smov %s317_s10 }
  0xae   : > { %s458_s10 = smov %s321_s11  ;;  %s459_s11 = smov %s373_s17 }
  0xaf   : > { %s460_s12 = smov %s363_s14  ;;  %15 = sbr.rel (!%p13_p7) target bundleno = 3 (0x3), region = 72 }
  0xb4   :  { %183 = vsyncpa [#allocation3], 1 }
  0xb5   :  { %185 = vsyncpa [#allocation3 + $0x1], 1 }

</bundles_post_ra>
